<compile_context>
chip_gen: v7x
topology: tpu7x:2x2x1
jax: 0.10.0
libtpu: 0.0.40
codegen_flags: <defaults>
</compile_context>

<pallas_src>
import functools

import jax
import jax.numpy as jnp
from jax import lax
from jax.experimental import pallas as pl
from jax.experimental.pallas import tpu as pltpu

INPUT_SIZE = 1
HIDDEN = 32


def _rnn_chunk_kernel(x_ref, h0_ref, wih_ref, whh_ref, b_ref, wout_ref,
                      bout_ref, y_ref, hN_ref, hbuf_ref, *,
                      chunk, total_steps):
    # x_ref:    (B, TC)    lane-dense chunk of the (input_size==1) input
    # h0_ref:   (B, H)     initial hidden state (read only at chunk 0)
    # wih_ref:  (1, H)     W_ih^T
    # whh_ref:  (H, H)     W_hh^T
    # b_ref:    (1, H)     b_ih + b_hh
    # wout_ref: (1, H)     output Linear weight row
    # bout_ref: (1,)       output Linear bias (SMEM scalar)
    # y_ref:    (B, TC)    per-timestep Linear output, lane-dense (T on lanes)
    # hN_ref:   (B, H)     resident output block: h carry across chunks / h_n
    # hbuf_ref: (TC, B, H) single reused VMEM scratch (projection, then h_t)
    c = pl.program_id(0)
    TC = chunk

    @pl.when(c == 0)
    def _():
        hN_ref[...] = h0_ref[...]

    wih = wih_ref[...]          # (1, H)
    whh = whh_ref[...]          # (H, H) — read once, reused every step
    b = b_ref[...]              # (1, H)

    # ---- Hoisted input projection, one vectorized pass over the chunk:
    #      pre[t, b, h] = x[b, t] * W_ih[h] + (b_ih + b_hh)[h]
    x_tb = x_ref[...].T                                    # (TC, B)
    hbuf_ref[...] = x_tb[:, :, None] * wih + b             # (TC, B, H)

    needs_mask = (total_steps % TC) != 0                   # static

    # ---- Serial recurrence: per-step chain is one small MXU matmul + add +
    #      tanh (EUP) + scratch store. The projection slot is overwritten with
    #      h_t so the output Linear can reuse the same buffer.
    def step(t, h):
        # TODO(synk): weight-stationary pltpu.matmul_push_rhs / matmul_acc_lhs
        # or a VPU matvec may shorten the per-step latency; measure per chip.
        h_new = jnp.tanh(hbuf_ref[t] +
                         jnp.dot(h, whh, preferred_element_type=jnp.float32))
        if needs_mask:
            h_new = jnp.where(c * TC + t < total_steps, h_new, h)
        hbuf_ref[t] = h_new
        return h_new

    h = lax.fori_loop(0, TC, step, hN_ref[...], unroll=min(8, TC))
    hN_ref[...] = h

    # ---- Output Linear deferred out of the recurrence: one lane reduction
    #      over H for the whole chunk, one lane-dense (B, TC) store.
    h_all = hbuf_ref[...]                                             # (TC,B,H)
    y_tb = jnp.sum(h_all * wout_ref[...], axis=-1) + bout_ref[0]      # (TC,B)
    y_ref[...] = y_tb.T.astype(y_ref.dtype)                           # (B,TC)


def rnn_forward(x, h_state, params, *, chunk=256):
    """x: (B, T, 1) float32; h_state: (1, B, H) or None.
    Returns (outs, h_state) matching the PyTorch module:
      outs: (B, T, 1), h_state: (1, B, H)."""
    B, T, I = x.shape
    if I != INPUT_SIZE or I != 1:
        raise ValueError("rnn_forward: kernel requires input_size == 1")
    H = HIDDEN

    # Pad batch to a full sublane tile; chunk T so VMEM is bounded for long T.
    B_pad = ((max(B, 8) + 7) // 8) * 8
    if T <= chunk:
        TC, T_pad = T, T
    else:
        TC = chunk
        T_pad = pl.cdiv(T, TC) * TC
    n_chunks = T_pad // TC

    if h_state is None:
        h0 = jnp.zeros((B, H), jnp.float32)
    else:
        h0 = h_state.reshape(B, H).astype(jnp.float32)

    x_bt = jnp.reshape(x.astype(jnp.float32), (B, T))       # squeeze size-1 dim
    x_bt = jnp.pad(x_bt, ((0, B_pad - B), (0, T_pad - T)))  # (B_pad, T_pad)
    h0_p = jnp.pad(h0, ((0, B_pad - B), (0, 0)))            # (B_pad, H)

    wih_t = params["w_ih"].T.astype(jnp.float32)             # (1, H)
    whh_t = params["w_hh"].T.astype(jnp.float32)             # (H, H)
    b = (params["b_ih"] + params["b_hh"]).reshape(1, H).astype(jnp.float32)
    wout = params["w_out"].reshape(1, H).astype(jnp.float32)
    bout = params["b_out"].reshape(1).astype(jnp.float32)

    vmem_full = pl.BlockSpec(memory_space=pltpu.MemorySpace.VMEM)
    smem_full = pl.BlockSpec(memory_space=pltpu.MemorySpace.SMEM)

    kernel = functools.partial(_rnn_chunk_kernel, chunk=TC, total_steps=T)

    y_bt, h_n = pl.pallas_call(
        kernel,
        out_shape=(
            jax.ShapeDtypeStruct((B_pad, T_pad), jnp.float32),  # y, lane-dense
            jax.ShapeDtypeStruct((B_pad, H), jnp.float32),      # final hidden
        ),
        grid_spec=pltpu.PrefetchScalarGridSpec(
            num_scalar_prefetch=0,
            grid=(n_chunks,),
            in_specs=[
                pl.BlockSpec((B_pad, TC), lambda c: (0, c)),    # x chunk
                vmem_full,                                      # h0
                vmem_full,                                      # W_ih^T
                vmem_full,                                      # W_hh^T
                vmem_full,                                      # fused bias
                vmem_full,                                      # W_out row
                smem_full,                                      # b_out scalar
            ],
            out_specs=(
                pl.BlockSpec((B_pad, TC), lambda c: (0, c)),    # y chunk
                pl.BlockSpec((B_pad, H), lambda c: (0, 0)),     # h carry / h_n
            ),
            scratch_shapes=[pltpu.VMEM((TC, B_pad, H), jnp.float32)],
        ),
        compiler_params=pltpu.CompilerParams(
            dimension_semantics=("arbitrary",)),
    )(x_bt, h0_p, wih_t, whh_t, b, wout, bout)

    outs = y_bt[:B, :T][:, :, None]                         # (B, T, 1)
    return outs, h_n[:B].reshape(1, B, H)


def rnn_reference(x, h_state, params):
    """Pure-JAX reference matching the PyTorch module."""
    B, T, _ = x.shape
    h0 = (jnp.zeros((B, HIDDEN), jnp.float32) if h_state is None
          else h_state.reshape(B, HIDDEN).astype(jnp.float32))
    wih, whh = params["w_ih"], params["w_hh"]
    bih, bhh = params["b_ih"], params["b_hh"]
    wout, bout = params["w_out"], params["b_out"]

    def step(h, x_t):
        h_new = jnp.tanh(x_t @ wih.T + bih + h @ whh.T + bhh)
        y = h_new @ wout.T + bout
        return h_new, y

    h_n, ys = lax.scan(step, h0, jnp.transpose(x, (1, 0, 2)))
    return jnp.transpose(ys, (1, 0, 2)), h_n.reshape(1, B, HIDDEN)


def init_params(key):
    # PyTorch default init: uniform(-1/sqrt(H), 1/sqrt(H)) for RNN and Linear.
    H, I = HIDDEN, INPUT_SIZE
    bound = 1.0 / jnp.sqrt(jnp.float32(H))
    ks = jax.random.split(key, 6)
    u = lambda k, shape: jax.random.uniform(k, shape, jnp.float32, -bound, bound)
    return {
        "w_ih": u(ks[0], (H, I)),
        "w_hh": u(ks[1], (H, H)),
        "b_ih": u(ks[2], (H,)),
        "b_hh": u(ks[3], (H,)),
        "w_out": u(ks[4], (1, H)),
        "b_out": u(ks[5], (1,)),
    }


if __name__ == "__main__":
    key = jax.random.PRNGKey(0)
    pkey, xkey = jax.random.split(key)
    params = init_params(pkey)

    B, T = 2, 8
    x = jax.random.normal(xkey, (B, T, INPUT_SIZE), jnp.float32)
    h_state = None   # matches the module's global default

    outs, h_n = rnn_forward(x, h_state, params)
    jax.block_until_ready((outs, h_n))

    assert outs.shape == (B, T, 1)
    assert h_n.shape == (1, B, HIDDEN)

    # Correctness check against the pure-JAX reference.
    ref_outs, ref_hn = rnn_reference(x, h_state, params)
    assert jnp.allclose(outs, ref_outs, atol=1e-4, rtol=1e-4)
    assert jnp.allclose(h_n, ref_hn, atol=1e-4, rtol=1e-4)

    print("KERNEL_OK")
</pallas_src>

<mosaic_0001>
module attributes {stable_mosaic.version = 11 : i64} {
  func.func @_rnn_chunk_kernel(%arg0: i32, %arg1: memref<8x8xf32, #tpu.memory_space<vmem>>, %arg2: memref<8x32xf32, #tpu.memory_space<vmem>>, %arg3: memref<1x32xf32, #tpu.memory_space<vmem>>, %arg4: memref<32x32xf32, #tpu.memory_space<vmem>>, %arg5: memref<1x32xf32, #tpu.memory_space<vmem>>, %arg6: memref<1x32xf32, #tpu.memory_space<vmem>>, %arg7: memref<1xf32, #tpu.memory_space<smem>>, %arg8: memref<8x8xf32, #tpu.memory_space<vmem>>, %arg9: memref<8x32xf32, #tpu.memory_space<vmem>>, %arg10: memref<8x8x32xf32, #tpu.memory_space<vmem>>) attributes {dimension_semantics = [#tpu.dimension_semantics<arbitrary>], iteration_bounds = array<i64: 1>, scalar_prefetch = 0 : i64, scratch_operands = 1 : i64, tpu.core_type = #tpu.core_type<tc>, window_params = [{transform_indices = @transform_0, window_bounds = array<i64: 8, 8>}, {pipeline_mode = #tpu.pipeline_mode<synchronous>, transform_indices = @transform_1, window_bounds = array<i64: 8, 32>}, {pipeline_mode = #tpu.pipeline_mode<synchronous>, transform_indices = @transform_2, window_bounds = array<i64: 1, 32>}, {pipeline_mode = #tpu.pipeline_mode<synchronous>, transform_indices = @transform_3, window_bounds = array<i64: 32, 32>}, {pipeline_mode = #tpu.pipeline_mode<synchronous>, transform_indices = @transform_4, window_bounds = array<i64: 1, 32>}, {pipeline_mode = #tpu.pipeline_mode<synchronous>, transform_indices = @transform_5, window_bounds = array<i64: 1, 32>}, {transform_indices = @transform_6, window_bounds = array<i64: 1>}, {transform_indices = @transform_7, window_bounds = array<i64: 8, 8>}, {pipeline_mode = #tpu.pipeline_mode<synchronous>, transform_indices = @transform_8, window_bounds = array<i64: 8, 32>}]} {
    %c0_i32 = arith.constant 0 : i32
    %0 = arith.cmpi eq, %arg0, %c0_i32 : i32
    %1 = arith.extui %0 : i1 to i32
    %c0_i32_0 = arith.constant 0 : i32
    %2 = arith.cmpi ne, %1, %c0_i32_0 : i32
    scf.if %2 {
      %c0_64 = arith.constant 0 : index
      %c0_65 = arith.constant 0 : index
      %110 = vector.load %arg2[%c0_64, %c0_65] : memref<8x32xf32, #tpu.memory_space<vmem>>, vector<8x32xf32>
      %c0_66 = arith.constant 0 : index
      %c0_67 = arith.constant 0 : index
      %111 = vector.load %arg9[%c0_66, %c0_67] : memref<8x32xf32, #tpu.memory_space<vmem>>, vector<8x32xf32>
      tpu.vector_store %arg9[%c0_66, %c0_67], %110 {strides = array<i32>} : memref<8x32xf32, #tpu.memory_space<vmem>>, vector<8x32xf32>,
    } else {
    }
    %c0 = arith.constant 0 : index
    %c0_1 = arith.constant 0 : index
    %3 = vector.load %arg3[%c0, %c0_1] : memref<1x32xf32, #tpu.memory_space<vmem>>, vector<1x32xf32>
    %c0_2 = arith.constant 0 : index
    %c0_3 = arith.constant 0 : index
    %4 = vector.load %arg4[%c0_2, %c0_3] : memref<32x32xf32, #tpu.memory_space<vmem>>, vector<32x32xf32>
    %c0_4 = arith.constant 0 : index
    %c0_5 = arith.constant 0 : index
    %5 = vector.load %arg5[%c0_4, %c0_5] : memref<1x32xf32, #tpu.memory_space<vmem>>, vector<1x32xf32>
    %c0_6 = arith.constant 0 : index
    %c0_7 = arith.constant 0 : index
    %6 = vector.load %arg1[%c0_6, %c0_7] : memref<8x8xf32, #tpu.memory_space<vmem>>, vector<8x8xf32>
    %7 = tpu.transpose %6, [1, 0] : vector<8x8xf32> -> vector<8x8xf32>
    %8 = vector.shape_cast %7 : vector<8x8xf32> to vector<8x8x1xf32>
    %9 = vector.shape_cast %3 : vector<1x32xf32> to vector<1x1x32xf32>
    %10 = vector.broadcast %8 : vector<8x8x1xf32> to vector<8x8x32xf32>
    %11 = vector.broadcast %9 : vector<1x1x32xf32> to vector<8x8x32xf32>
    %12 = arith.mulf %10, %11 : vector<8x8x32xf32>
    %13 = vector.shape_cast %5 : vector<1x32xf32> to vector<1x1x32xf32>
    %14 = vector.broadcast %13 : vector<1x1x32xf32> to vector<8x8x32xf32>
    %15 = arith.addf %12, %14 : vector<8x8x32xf32>
    %c0_8 = arith.constant 0 : index
    %c0_9 = arith.constant 0 : index
    %c0_10 = arith.constant 0 : index
    %16 = vector.load %arg10[%c0_8, %c0_9, %c0_10] : memref<8x8x32xf32, #tpu.memory_space<vmem>>, vector<8x8x32xf32>
    tpu.vector_store %arg10[%c0_8, %c0_9, %c0_10], %15 {strides = array<i32>} : memref<8x8x32xf32, #tpu.memory_space<vmem>>, vector<8x8x32xf32>,
    %c0_11 = arith.constant 0 : index
    %c0_12 = arith.constant 0 : index
    %17 = vector.load %arg9[%c0_11, %c0_12] : memref<8x32xf32, #tpu.memory_space<vmem>>, vector<8x32xf32>
    %c0_i32_13 = arith.constant 0 : i32
    %18 = arith.index_cast %c0_i32_13 : i32 to index
    %c0_14 = arith.constant 0 : index
    %c0_15 = arith.constant 0 : index
    %19 = vector.load %arg10[%18, %c0_14, %c0_15] : memref<8x8x32xf32, #tpu.memory_space<vmem>>, vector<1x8x32xf32>
    %20 = vector.shape_cast %19 : vector<1x8x32xf32> to vector<8x32xf32>
    %cst = arith.constant dense<0.000000e+00> : vector<8x32xf32>
    %21 = tpu.matmul %17, %4, %cst {dimension_numbers = #tpu.dot_dimension_numbers<[1], [0], [0], [1], [0, 0, 1, 1], [], []>} : vector<8x32xf32>, vector<32x32xf32>, vector<8x32xf32> -> vector<8x32xf32>
    %22 = arith.addf %20, %21 : vector<8x32xf32>
    %23 = math.tanh %22 : vector<8x32xf32>
    %24 = arith.index_cast %c0_i32_13 : i32 to index
    %c0_16 = arith.constant 0 : index
    %c0_17 = arith.constant 0 : index
    %25 = vector.load %arg10[%24, %c0_16, %c0_17] : memref<8x8x32xf32, #tpu.memory_space<vmem>>, vector<1x8x32xf32>
    %26 = vector.shape_cast %25 : vector<1x8x32xf32> to vector<8x32xf32>
    %27 = vector.shape_cast %23 : vector<8x32xf32> to vector<1x8x32xf32>
    tpu.vector_store %arg10[%24, %c0_16, %c0_17], %27 {strides = array<i32>} : memref<8x8x32xf32, #tpu.memory_space<vmem>>, vector<1x8x32xf32>,
    %c1_i32 = arith.constant 1 : i32
    %28 = arith.index_cast %c1_i32 : i32 to index
    %c0_18 = arith.constant 0 : index
    %c0_19 = arith.constant 0 : index
    %29 = vector.load %arg10[%28, %c0_18, %c0_19] : memref<8x8x32xf32, #tpu.memory_space<vmem>>, vector<1x8x32xf32>
    %30 = vector.shape_cast %29 : vector<1x8x32xf32> to vector<8x32xf32>
    %cst_20 = arith.constant dense<0.000000e+00> : vector<8x32xf32>
    %31 = tpu.matmul %23, %4, %cst_20 {dimension_numbers = #tpu.dot_dimension_numbers<[1], [0], [0], [1], [0, 0, 1, 1], [], []>} : vector<8x32xf32>, vector<32x32xf32>, vector<8x32xf32> -> vector<8x32xf32>
    %32 = arith.addf %30, %31 : vector<8x32xf32>
    %33 = math.tanh %32 : vector<8x32xf32>
    %34 = arith.index_cast %c1_i32 : i32 to index
    %c0_21 = arith.constant 0 : index
    %c0_22 = arith.constant 0 : index
    %35 = vector.load %arg10[%34, %c0_21, %c0_22] : memref<8x8x32xf32, #tpu.memory_space<vmem>>, vector<1x8x32xf32>
    %36 = vector.shape_cast %35 : vector<1x8x32xf32> to vector<8x32xf32>
    %37 = vector.shape_cast %33 : vector<8x32xf32> to vector<1x8x32xf32>
    tpu.vector_store %arg10[%34, %c0_21, %c0_22], %37 {strides = array<i32>} : memref<8x8x32xf32, #tpu.memory_space<vmem>>, vector<1x8x32xf32>,
    %c2_i32 = arith.constant 2 : i32
    %38 = arith.index_cast %c2_i32 : i32 to index
    %c0_23 = arith.constant 0 : index
    %c0_24 = arith.constant 0 : index
    %39 = vector.load %arg10[%38, %c0_23, %c0_24] : memref<8x8x32xf32, #tpu.memory_space<vmem>>, vector<1x8x32xf32>
    %40 = vector.shape_cast %39 : vector<1x8x32xf32> to vector<8x32xf32>
    %cst_25 = arith.constant dense<0.000000e+00> : vector<8x32xf32>
    %41 = tpu.matmul %33, %4, %cst_25 {dimension_numbers = #tpu.dot_dimension_numbers<[1], [0], [0], [1], [0, 0, 1, 1], [], []>} : vector<8x32xf32>, vector<32x32xf32>, vector<8x32xf32> -> vector<8x32xf32>
    %42 = arith.addf %40, %41 : vector<8x32xf32>
    %43 = math.tanh %42 : vector<8x32xf32>
    %44 = arith.index_cast %c2_i32 : i32 to index
    %c0_26 = arith.constant 0 : index
    %c0_27 = arith.constant 0 : index
    %45 = vector.load %arg10[%44, %c0_26, %c0_27] : memref<8x8x32xf32, #tpu.memory_space<vmem>>, vector<1x8x32xf32>
    %46 = vector.shape_cast %45 : vector<1x8x32xf32> to vector<8x32xf32>
    %47 = vector.shape_cast %43 : vector<8x32xf32> to vector<1x8x32xf32>
    tpu.vector_store %arg10[%44, %c0_26, %c0_27], %47 {strides = array<i32>} : memref<8x8x32xf32, #tpu.memory_space<vmem>>, vector<1x8x32xf32>,
    %c3_i32 = arith.constant 3 : i32
    %48 = arith.index_cast %c3_i32 : i32 to index
    %c0_28 = arith.constant 0 : index
    %c0_29 = arith.constant 0 : index
    %49 = vector.load %arg10[%48, %c0_28, %c0_29] : memref<8x8x32xf32, #tpu.memory_space<vmem>>, vector<1x8x32xf32>
    %50 = vector.shape_cast %49 : vector<1x8x32xf32> to vector<8x32xf32>
    %cst_30 = arith.constant dense<0.000000e+00> : vector<8x32xf32>
    %51 = tpu.matmul %43, %4, %cst_30 {dimension_numbers = #tpu.dot_dimension_numbers<[1], [0], [0], [1], [0, 0, 1, 1], [], []>} : vector<8x32xf32>, vector<32x32xf32>, vector<8x32xf32> -> vector<8x32xf32>
    %52 = arith.addf %50, %51 : vector<8x32xf32>
    %53 = math.tanh %52 : vector<8x32xf32>
    %54 = arith.index_cast %c3_i32 : i32 to index
    %c0_31 = arith.constant 0 : index
    %c0_32 = arith.constant 0 : index
    %55 = vector.load %arg10[%54, %c0_31, %c0_32] : memref<8x8x32xf32, #tpu.memory_space<vmem>>, vector<1x8x32xf32>
    %56 = vector.shape_cast %55 : vector<1x8x32xf32> to vector<8x32xf32>
    %57 = vector.shape_cast %53 : vector<8x32xf32> to vector<1x8x32xf32>
    tpu.vector_store %arg10[%54, %c0_31, %c0_32], %57 {strides = array<i32>} : memref<8x8x32xf32, #tpu.memory_space<vmem>>, vector<1x8x32xf32>,
    %c4_i32 = arith.constant 4 : i32
    %58 = arith.index_cast %c4_i32 : i32 to index
    %c0_33 = arith.constant 0 : index
    %c0_34 = arith.constant 0 : index
    %59 = vector.load %arg10[%58, %c0_33, %c0_34] : memref<8x8x32xf32, #tpu.memory_space<vmem>>, vector<1x8x32xf32>
    %60 = vector.shape_cast %59 : vector<1x8x32xf32> to vector<8x32xf32>
    %cst_35 = arith.constant dense<0.000000e+00> : vector<8x32xf32>
    %61 = tpu.matmul %53, %4, %cst_35 {dimension_numbers = #tpu.dot_dimension_numbers<[1], [0], [0], [1], [0, 0, 1, 1], [], []>} : vector<8x32xf32>, vector<32x32xf32>, vector<8x32xf32> -> vector<8x32xf32>
    %62 = arith.addf %60, %61 : vector<8x32xf32>
    %63 = math.tanh %62 : vector<8x32xf32>
    %64 = arith.index_cast %c4_i32 : i32 to index
    %c0_36 = arith.constant 0 : index
    %c0_37 = arith.constant 0 : index
    %65 = vector.load %arg10[%64, %c0_36, %c0_37] : memref<8x8x32xf32, #tpu.memory_space<vmem>>, vector<1x8x32xf32>
    %66 = vector.shape_cast %65 : vector<1x8x32xf32> to vector<8x32xf32>
    %67 = vector.shape_cast %63 : vector<8x32xf32> to vector<1x8x32xf32>
    tpu.vector_store %arg10[%64, %c0_36, %c0_37], %67 {strides = array<i32>} : memref<8x8x32xf32, #tpu.memory_space<vmem>>, vector<1x8x32xf32>,
    %c5_i32 = arith.constant 5 : i32
    %68 = arith.index_cast %c5_i32 : i32 to index
    %c0_38 = arith.constant 0 : index
    %c0_39 = arith.constant 0 : index
    %69 = vector.load %arg10[%68, %c0_38, %c0_39] : memref<8x8x32xf32, #tpu.memory_space<vmem>>, vector<1x8x32xf32>
    %70 = vector.shape_cast %69 : vector<1x8x32xf32> to vector<8x32xf32>
    %cst_40 = arith.constant dense<0.000000e+00> : vector<8x32xf32>
    %71 = tpu.matmul %63, %4, %cst_40 {dimension_numbers = #tpu.dot_dimension_numbers<[1], [0], [0], [1], [0, 0, 1, 1], [], []>} : vector<8x32xf32>, vector<32x32xf32>, vector<8x32xf32> -> vector<8x32xf32>
    %72 = arith.addf %70, %71 : vector<8x32xf32>
    %73 = math.tanh %72 : vector<8x32xf32>
    %74 = arith.index_cast %c5_i32 : i32 to index
    %c0_41 = arith.constant 0 : index
    %c0_42 = arith.constant 0 : index
    %75 = vector.load %arg10[%74, %c0_41, %c0_42] : memref<8x8x32xf32, #tpu.memory_space<vmem>>, vector<1x8x32xf32>
    %76 = vector.shape_cast %75 : vector<1x8x32xf32> to vector<8x32xf32>
    %77 = vector.shape_cast %73 : vector<8x32xf32> to vector<1x8x32xf32>
    tpu.vector_store %arg10[%74, %c0_41, %c0_42], %77 {strides = array<i32>} : memref<8x8x32xf32, #tpu.memory_space<vmem>>, vector<1x8x32xf32>,
    %c6_i32 = arith.constant 6 : i32
    %78 = arith.index_cast %c6_i32 : i32 to index
    %c0_43 = arith.constant 0 : index
    %c0_44 = arith.constant 0 : index
    %79 = vector.load %arg10[%78, %c0_43, %c0_44] : memref<8x8x32xf32, #tpu.memory_space<vmem>>, vector<1x8x32xf32>
    %80 = vector.shape_cast %79 : vector<1x8x32xf32> to vector<8x32xf32>
    %cst_45 = arith.constant dense<0.000000e+00> : vector<8x32xf32>
    %81 = tpu.matmul %73, %4, %cst_45 {dimension_numbers = #tpu.dot_dimension_numbers<[1], [0], [0], [1], [0, 0, 1, 1], [], []>} : vector<8x32xf32>, vector<32x32xf32>, vector<8x32xf32> -> vector<8x32xf32>
    %82 = arith.addf %80, %81 : vector<8x32xf32>
    %83 = math.tanh %82 : vector<8x32xf32>
    %84 = arith.index_cast %c6_i32 : i32 to index
    %c0_46 = arith.constant 0 : index
    %c0_47 = arith.constant 0 : index
    %85 = vector.load %arg10[%84, %c0_46, %c0_47] : memref<8x8x32xf32, #tpu.memory_space<vmem>>, vector<1x8x32xf32>
    %86 = vector.shape_cast %85 : vector<1x8x32xf32> to vector<8x32xf32>
    %87 = vector.shape_cast %83 : vector<8x32xf32> to vector<1x8x32xf32>
    tpu.vector_store %arg10[%84, %c0_46, %c0_47], %87 {strides = array<i32>} : memref<8x8x32xf32, #tpu.memory_space<vmem>>, vector<1x8x32xf32>,
    %c7_i32 = arith.constant 7 : i32
    %88 = arith.index_cast %c7_i32 : i32 to index
    %c0_48 = arith.constant 0 : index
    %c0_49 = arith.constant 0 : index
    %89 = vector.load %arg10[%88, %c0_48, %c0_49] : memref<8x8x32xf32, #tpu.memory_space<vmem>>, vector<1x8x32xf32>
    %90 = vector.shape_cast %89 : vector<1x8x32xf32> to vector<8x32xf32>
    %cst_50 = arith.constant dense<0.000000e+00> : vector<8x32xf32>
    %91 = tpu.matmul %83, %4, %cst_50 {dimension_numbers = #tpu.dot_dimension_numbers<[1], [0], [0], [1], [0, 0, 1, 1], [], []>} : vector<8x32xf32>, vector<32x32xf32>, vector<8x32xf32> -> vector<8x32xf32>
    %92 = arith.addf %90, %91 : vector<8x32xf32>
    %93 = math.tanh %92 : vector<8x32xf32>
    %94 = arith.index_cast %c7_i32 : i32 to index
    %c0_51 = arith.constant 0 : index
    %c0_52 = arith.constant 0 : index
    %95 = vector.load %arg10[%94, %c0_51, %c0_52] : memref<8x8x32xf32, #tpu.memory_space<vmem>>, vector<1x8x32xf32>
    %96 = vector.shape_cast %95 : vector<1x8x32xf32> to vector<8x32xf32>
    %97 = vector.shape_cast %93 : vector<8x32xf32> to vector<1x8x32xf32>
    tpu.vector_store %arg10[%94, %c0_51, %c0_52], %97 {strides = array<i32>} : memref<8x8x32xf32, #tpu.memory_space<vmem>>, vector<1x8x32xf32>,
    %c8_i32 = arith.constant 8 : i32
    %c0_53 = arith.constant 0 : index
    %c0_54 = arith.constant 0 : index
    %98 = vector.load %arg9[%c0_53, %c0_54] : memref<8x32xf32, #tpu.memory_space<vmem>>, vector<8x32xf32>
    tpu.vector_store %arg9[%c0_53, %c0_54], %93 {strides = array<i32>} : memref<8x32xf32, #tpu.memory_space<vmem>>, vector<8x32xf32>,
    %c0_55 = arith.constant 0 : index
    %c0_56 = arith.constant 0 : index
    %c0_57 = arith.constant 0 : index
    %99 = vector.load %arg10[%c0_55, %c0_56, %c0_57] : memref<8x8x32xf32, #tpu.memory_space<vmem>>, vector<8x8x32xf32>
    %c0_58 = arith.constant 0 : index
    %c0_59 = arith.constant 0 : index
    %100 = vector.load %arg6[%c0_58, %c0_59] : memref<1x32xf32, #tpu.memory_space<vmem>>, vector<1x32xf32>
    %101 = vector.shape_cast %100 : vector<1x32xf32> to vector<1x1x32xf32>
    %102 = vector.broadcast %101 : vector<1x1x32xf32> to vector<8x8x32xf32>
    %103 = arith.mulf %99, %102 : vector<8x8x32xf32>
    %cst_60 = arith.constant dense<0.000000e+00> : vector<8x8xf32>
    %104 = vector.multi_reduction <add>, %103, %cst_60 [2] : vector<8x8x32xf32> to vector<8x8xf32>
    %c0_61 = arith.constant 0 : index
    %105 = memref.load %arg7[%c0_61] : memref<1xf32, #tpu.memory_space<smem>>
    %106 = vector.broadcast %105 : f32 to vector<8x8xf32>
    %107 = arith.addf %104, %106 : vector<8x8xf32>
    %108 = tpu.transpose %107, [1, 0] : vector<8x8xf32> -> vector<8x8xf32>
    %c0_62 = arith.constant 0 : index
    %c0_63 = arith.constant 0 : index
    %109 = vector.load %arg8[%c0_62, %c0_63] : memref<8x8xf32, #tpu.memory_space<vmem>>, vector<8x8xf32>
    tpu.vector_store %arg8[%c0_62, %c0_63], %108 {strides = array<i32>} : memref<8x8xf32, #tpu.memory_space<vmem>>, vector<8x8xf32>,
    return
  }
  func.func @transform_0(%arg0: i32) -> (i32, i32) {
    %c0_i32 = arith.constant 0 : i32
    %c0_i32_0 = arith.constant 0 : i32
    return %c0_i32, %arg0 : i32, i32
  }
  func.func @transform_1(%arg0: i32) -> (i32, i32) {
    %c0_i32 = arith.constant 0 : i32
    %c0_i32_0 = arith.constant 0 : i32
    %c0_i32_1 = arith.constant 0 : i32
    return %c0_i32, %c0_i32_0 : i32, i32
  }
  func.func @transform_2(%arg0: i32) -> (i32, i32) {
    %c0_i32 = arith.constant 0 : i32
    %c0_i32_0 = arith.constant 0 : i32
    %c0_i32_1 = arith.constant 0 : i32
    return %c0_i32, %c0_i32_0 : i32, i32
  }
  func.func @transform_3(%arg0: i32) -> (i32, i32) {
    %c0_i32 = arith.constant 0 : i32
    %c0_i32_0 = arith.constant 0 : i32
    %c0_i32_1 = arith.constant 0 : i32
    return %c0_i32, %c0_i32_0 : i32, i32
  }
  func.func @transform_4(%arg0: i32) -> (i32, i32) {
    %c0_i32 = arith.constant 0 : i32
    %c0_i32_0 = arith.constant 0 : i32
    %c0_i32_1 = arith.constant 0 : i32
    return %c0_i32, %c0_i32_0 : i32, i32
  }
  func.func @transform_5(%arg0: i32) -> (i32, i32) {
    %c0_i32 = arith.constant 0 : i32
    %c0_i32_0 = arith.constant 0 : i32
    %c0_i32_1 = arith.constant 0 : i32
    return %c0_i32, %c0_i32_0 : i32, i32
  }
  func.func @transform_6(%arg0: i32) -> i32 {
    %c0_i32 = arith.constant 0 : i32
    %c0_i32_0 = arith.constant 0 : i32
    return %c0_i32 : i32
  }
  func.func @transform_7(%arg0: i32) -> (i32, i32) {
    %c0_i32 = arith.constant 0 : i32
    %c0_i32_0 = arith.constant 0 : i32
    return %c0_i32, %arg0 : i32, i32
  }
  func.func @transform_8(%arg0: i32) -> (i32, i32) {
    %c0_i32 = arith.constant 0 : i32
    %c0_i32_0 = arith.constant 0 : i32
    %c0_i32_1 = arith.constant 0 : i32
    return %c0_i32, %c0_i32_0 : i32, i32
  }
}

</mosaic_0001>

<bundles_post_ra>
// kernel: tpu_custom_call.1
= control target key start
LH: loop header
LB: loop body
LE: loop exit
PB: predicated region body
PF: predicated region fallthrough
CT: control target
= control target key end

     0   :  { %15 = vsyncpa [#allocation5], 0  ;;  %s1577_s0 = inlined_call_operand.hbm [shape: f32[8,8], index: 0, kind: input, shape index: {}]   ;;  %s1578_s1 = inlined_call_operand.hbm [shape: f32[8,32], index: 1, kind: input, shape index: {}]   ;;  %s1579_s2 = inlined_call_operand.vmem [shape: f32[1,32], index: 2, kind: input, shape index: {}]   ;;  %s1580_s3 = inlined_call_operand.hbm [shape: f32[32,32], index: 3, kind: input, shape index: {}]   ;;  %s1581_s4 = inlined_call_operand.vmem [shape: f32[1,32], index: 4, kind: input, shape index: {}]   ;;  %s1582_s5 = inlined_call_operand.vmem [shape: f32[1,32], index: 5, kind: input, shape index: {}]   ;;  %s1583_s6 = inlined_call_operand.<no memory space> [shape: f32[1], index: 6, kind: input, shape index: {}]   ;;  %s1584_s7 = inlined_call_operand.hbm [shape: f32[8,8], index: 7, kind: output, shape index: {0}]   ;;  %s1585_s8 = inlined_call_operand.hbm [shape: f32[8,32], index: 8, kind: output, shape index: {1}]  }
   0x1   :  { %16 = vsyncpa [#allocation8], 0 }
   0x2   :  { %17 = vsyncpa [#allocation6], 0 }
   0x3   :  { %18 = vsyncpa [#allocation12], 0  ;;  %s1341_s27 = smov [#allocation7]   ;;  %s1342_s29 = smov [#allocation4]  }
   0x4   :  { %s35_s28 = sshll.u32 %s1341_s27, 4  ;;  %s25_s30 = sshll.u32 %s1342_s29, 4  ;;  %s36_s28 = int_to_ptr.vmem [resolvable:$true] %s35_s28  ;;  %s26_s30 = int_to_ptr.vmem [resolvable:$true] %s25_s30 }
   0x5   :  { %s1223_s11 = scalar_lea.hbm %s1578_s1, 128 }
   0x6   :  { %p1224_p0 = scmp.ne.s32.totalorder %s1578_s1, %s1223_s11  ;;  %p1227_p1 = scmp.lt.u32.totalorder %s1223_s11, %s1578_s1 }
   0x8   :  { %p1229_p2 = pnand %p1227_p1, %p1224_p0 }
   0xa   :  { %1232 = shalt.err (!%p1229_p2)
}
   0xb   :  { %s1233_s16 = scalar_lea.vmem %s36_s28, 128  ;;  %p1238_p4 = scmp.lt.s32.totalorder %s36_s28, %s36_s28 }
   0xc   :  { %p1234_p3 = scmp.ne.s32.totalorder %s36_s28, %s1233_s16  ;;  %p1239_p5 = scmp.lt.s32.totalorder %s1233_s16, %s1233_s16 }
   0xe   :  { %p1240_p6 = por %p1239_p5, %p1238_p4 }
  0x10   :  { %p1241_p7 = pnand %p1240_p6, %p1234_p3 }
  0x12   :  { %1244 = shalt.err (!%p1241_p7)
}
  0x13   :  { %38 = dma.hbm_to_vmem [thread:$0]  %s1578_s1, 128, %s36_s28, [#allocation8]  }
  0x14   :  { %s1245_s21 = scalar_lea.hbm %s1577_s0, 128 }
  0x15   :  { %p1246_p8 = scmp.ne.s32.totalorder %s1577_s0, %s1245_s21  ;;  %p1249_p9 = scmp.lt.u32.totalorder %s1245_s21, %s1577_s0 }
  0x17   :  { %p1251_p10 = pnand %p1249_p9, %p1246_p8 }
  0x19   :  { %1254 = shalt.err (!%p1251_p10)
}
  0x1a   :  { %s1255_s26 = scalar_lea.vmem %s26_s30, 128  ;;  %p1260_p12 = scmp.lt.s32.totalorder %s26_s30, %s26_s30 }
  0x1b   :  { %p1256_p11 = scmp.ne.s32.totalorder %s26_s30, %s1255_s26  ;;  %p1261_p13 = scmp.lt.s32.totalorder %s1255_s26, %s1255_s26 }
  0x1d   :  { %p1262_p0 = por %p1261_p13, %p1260_p12 }
  0x1f   :  { %p1263_p1 = pnand %p1262_p0, %p1256_p11 }
  0x21   :  { %1266 = shalt.err (!%p1263_p1)
}
  0x22   :  { %28 = dma.hbm_to_vmem [thread:$0]  %s1577_s0, 128, %s26_s30, [#allocation5]  }
  0x23   :  { %s1343_s28 = smov [#allocation9]   ;;  %s1267_s11 = scalar_lea.hbm %s1580_s3, 512 }
  0x24   :  { %s46_s29 = sshll.u32 %s1343_s28, 4  ;;  %p1268_p2 = scmp.ne.s32.totalorder %s1580_s3, %s1267_s11  ;;  %s47_s29 = int_to_ptr.vmem [resolvable:$true] %s46_s29 }
  0x25   :  { %p1271_p3 = scmp.lt.u32.totalorder %s1267_s11, %s1580_s3 }
  0x27   :  { %p1273_p4 = pnand %p1271_p3, %p1268_p2 }
  0x29   :  { %1276 = shalt.err (!%p1273_p4)
}
  0x2a   :  { %s1277_s16 = scalar_lea.vmem %s47_s29, 512  ;;  %p1282_p6 = scmp.lt.s32.totalorder %s47_s29, %s47_s29 }
  0x2b   :  { %p1278_p5 = scmp.ne.s32.totalorder %s47_s29, %s1277_s16  ;;  %p1283_p7 = scmp.lt.s32.totalorder %s1277_s16, %s1277_s16 }
  0x2d   :  { %p1284_p8 = por %p1283_p7, %p1282_p6 }
  0x2f   :  { %p1285_p9 = pnand %p1284_p8, %p1278_p5 }
  0x31   :  { %1288 = shalt.err (!%p1285_p9)
}
  0x32   :  { %s1344_s0 = smov 128   ;;  %s1345_s30 = smov 8  }
  0x33   :  { %52 = dma.hbm_to_vmem [thread:$0]  %s1580_s3, 512, %s47_s29, [#allocation8], %s1344_s0, %s1344_s0, %s1345_s30  }
  0x34   :  { %1333 = dma.done.wait [#allocation5], 128  }
  0x35   :  { %1334 = vsyncadd [#allocation5], 4294967168 }
  0x36   :  { %1335 = dma.done.wait [#allocation8], 640  }
  0x37   :  { %1336 = vsyncadd [#allocation8], 4294966656  ;;  %v1346_v0 = vmov 0.0|0.0   ;;  %vm1347_vm0 = vmmov 0   ;;  %v1348_v1 = vmov 0.0   ;;  %vm73_vm1 = vcmask 261120  }
  0x38   :  { %1149 = vmatprep.subr.bf16.mxu0 %v1346_v0  ;;  %1069 = vmatprep.mubr.msk.f32.mxu0 %vm1347_vm0, %v1348_v1  ;;  %v81_v2 = vld [vmem:[#allocation4] sm:$0xff]  ;;  %v76_v3 = vld [vmem:[#allocation9] sm:$0xff]  ;;  %v77_v4 = vld [vmem:[#allocation9 + $0x8] sm:$0xff]  ;;  %v114_v11 = vlaneseq  ;;  %vm931_vm2 = vcmask 1041409   ;;  %vm933_vm3 = vcmask 1042434   ;;  %vm935_vm4 = vcmask 1043459  }
  0x39   :  { %1155 = vmatprep.subr.bf16.mxu1 %v1346_v0  ;;  %1080 = vmatprep.mubr.msk.f32.mxu1 %vm1347_vm0, %v1348_v1  ;;  %v1438_v5 = vpack.c.bf16 %v77_v4, %v76_v3  ;;  %v78_v6 = vld [vmem:[#allocation9 + $0x10] sm:$0xff]  ;;  %v79_v7 = vld [vmem:[#allocation9 + $0x18] sm:$0xff]  ;;  %vm937_vm5 = vcmask 1044484   ;;  %vm939_vm6 = vcmask 1045509   ;;  %vm941_vm7 = vcmask 1046534  }
  0x3a   :  { %82 = vxpose.xlu0.b32.start.end [1/1] (short) (narrow) %v81_v2, 8  ;;  %v72_v8 = vld [vmem:[#allocation7] sm:$0xff]  ;;  %v1442_v9 = vpack.c.bf16 %v79_v7, %v78_v6  ;;  %v1459_v12 = vshrl.u32 %v114_v11, 7  ;;  %v1010_v32 = vld [vmem:[%s1579_s2] ss:$0 sm:$0xff]  ;;  %vm943_vm8 = vcmask 1047559  }
  0x3b   :  { %74 = vst.msk [vmem:[#allocation11] sm:$0xff] %vm73_vm1, %v72_v8  ;;  %1151 = vmatpush3.bf16.msra.mxu0 %v1438_v5  ;;  %1157 = vmatpush3.bf16.msra.mxu1 %v1438_v5  ;;  %v1011_v34 = vld [vmem:[%s1581_s4] ss:$0 sm:$0xff] }
  0x3c   :  { %1152 = vmatprep.subr.bf16.mxu0 %v1346_v0  ;;  %1158 = vmatprep.subr.bf16.mxu1 %v1346_v0  ;;  %v123_v13 = vsub.s32 1, %v1459_v12  ;;  %v116_v14 = vsub.s32 0, %v1459_v12  ;;  %v130_v18 = vsub.s32 2, %v1459_v12  ;;  %v137_v20 = vsub.s32 3, %v1459_v12  ;;  %v1492_v61 = vld [vmem:[%s1582_s5] ss:$0 sm:$0xff] }
  0x3d   :  { %v144_v22 = vsub.s32 4, %v1459_v12  ;;  %v151_v24 = vsub.s32 5, %v1459_v12  ;;  %v158_v26 = vsub.s32 6, %v1459_v12  ;;  %v165_v28 = vsub.s32 7, %v1459_v12 }
  0x3f   :  { %1154 = vmatpush3.bf16.msra.mxu0 %v1442_v9  ;;  %1160 = vmatpush3.bf16.msra.mxu1 %v1442_v9 }
  0x40   :  { %1161 = vmatprep.subr.bf16.mxu0 %v1346_v0  ;;  %1167 = vmatprep.subr.bf16.mxu1 %v1346_v0 }
  0x42   :  { %v207_v10 = vld [vmem:[#allocation11] sm:$0xff] }
  0x43   :  { %1070 = vmatmul.mubr.msk.f32.vlgmr.msra.gmra.mrb[0].mxu0 %vm73_vm1, %v207_v10 }
  0x44   :  { %1163 = vmatpush3.bf16.msra.mxu0 %v1438_v5  ;;  %1091 = vmatprep.mubr.msk.f32.mxu0 %vm1347_vm0, %v1348_v1 }
  0x45   :  { %1164 = vmatprep.subr.bf16.mxu0 %v1346_v0 }
  0x48   :  { %1166 = vmatpush3.bf16.msra.mxu0 %v1442_v9 }
  0x49   :  { %1173 = vmatprep.subr.bf16.mxu0 %v1346_v0 }
  0xba   :  { %v98_v15 = vpop.trf.xlu0 }
  0xbb   :  { %v124_v16 = vrot.slane %v98_v15, %v123_v13  ;;  %v117_v17 = vrot.slane %v98_v15, %v116_v14  ;;  %v131_v19 = vrot.slane %v98_v15, %v130_v18  ;;  %v138_v21 = vrot.slane %v98_v15, %v137_v20 }
  0xbc   :  { %v145_v23 = vrot.slane %v98_v15, %v144_v22  ;;  %v152_v25 = vrot.slane %v98_v15, %v151_v24  ;;  %v159_v27 = vrot.slane %v98_v15, %v158_v26  ;;  %v166_v29 = vrot.slane %v98_v15, %v165_v28 }
  0xbd   :  { %126 = vbcast.lane.b32.xlu1 %v124_v16, 256  ;;  %119 = vbcast.lane.b32.xlu0 %v117_v17, 256 }
  0xc1   :  { %133 = vbcast.lane.b32.xlu1 %v131_v19, 256 }
  0xc5   :  { %140 = vbcast.lane.b32.xlu1 %v138_v21, 256 }
  0xc9   :  { %147 = vbcast.lane.b32.xlu1 %v145_v23, 256 }
  0xcd   :  { %154 = vbcast.lane.b32.xlu1 %v152_v25, 256 }
  0xd1   :  { %161 = vbcast.lane.b32.xlu1 %v159_v27, 256 }
  0xd5   :  { %168 = vbcast.lane.b32.xlu1 %v166_v29, 256 }
 0x116   :  { %v278_v30 = vpop.f32.mrb[0].mxu0 }
 0x117   :  { %v1071_v31 = vpop.f32.mrb[1].mxu0 }
 0x12f   :  { %v127_v33 = vpop.permute.xlu1 %126  ;;  %v120_v35 = vpop.permute.xlu0 %119 }
 0x130   :  { %v177_v36 = vmul.f32 %v1010_v32, %v127_v33  ;;  %v176_v37 = vmul.f32 %v1010_v32, %v120_v35 }
 0x132   :  { %v191_v38 = vadd.f32 %v1011_v34, %v177_v36  ;;  %v190_v39 = vadd.f32 %v1011_v34, %v176_v37 }
 0x133   :  { %v134_v40 = vpop.permute.xlu1 %133 }
 0x134   :  { %200 = vst.msk [vmem:[#allocation2 + $0x8] sm:$0xff] %vm73_vm1, %v191_v38  ;;  %199 = vst.msk [vmem:[#allocation2] sm:$0xff] %vm73_vm1, %v190_v39  ;;  %v178_v41 = vmul.f32 %v1010_v32, %v134_v40 }
 0x136   :  { %v192_v42 = vadd.f32 %v1011_v34, %v178_v41 }
 0x137   :  { %v141_v43 = vpop.permute.xlu1 %140 }
 0x138   :  { %201 = vst.msk [vmem:[#allocation2 + $0x10] sm:$0xff] %vm73_vm1, %v192_v42  ;;  %v179_v44 = vmul.f32 %v1010_v32, %v141_v43 }
 0x13a   :  { %v193_v45 = vadd.f32 %v1011_v34, %v179_v44 }
 0x13b   :  { %v208_v46 = vld [vmem:[#allocation2] sm:$0xff]  ;;  %v148_v47 = vpop.permute.xlu1 %147  ;;  %v286_v3 = vld [vmem:[#allocation2 + $0x8] sm:$0xff] }
 0x13c   :  { %202 = vst.msk [vmem:[#allocation2 + $0x18] sm:$0xff] %vm73_vm1, %v193_v45  ;;  %v282_v48 = vadd.f32 %v278_v30, %v208_v46  ;;  %v180_v49 = vmul.f32 %v1010_v32, %v148_v47 }
 0x13e   :  { %1207 = vtanh.f32 %v282_v48  ;;  %v194_v50 = vadd.f32 %v1011_v34, %v180_v49 }
 0x13f   :  { %v155_v51 = vpop.permute.xlu1 %154  ;;  %v364_v15 = vld [vmem:[#allocation2 + $0x10] sm:$0xff] }
 0x140   :  { %203 = vst.msk [vmem:[#allocation2 + $0x20] sm:$0xff] %vm73_vm1, %v194_v50  ;;  %v181_v52 = vmul.f32 %v1010_v32, %v155_v51 }
 0x142   :  { %v195_v53 = vadd.f32 %v1011_v34, %v181_v52 }
 0x143   :  { %v162_v54 = vpop.permute.xlu1 %161  ;;  %v442_v23 = vld [vmem:[#allocation2 + $0x18] sm:$0xff] }
 0x144   :  { %204 = vst.msk [vmem:[#allocation2 + $0x28] sm:$0xff] %vm73_vm1, %v195_v53  ;;  %v182_v55 = vmul.f32 %v1010_v32, %v162_v54 }
 0x146   :  { %v196_v56 = vadd.f32 %v1011_v34, %v182_v55 }
 0x147   :  { %v169_v57 = vpop.permute.xlu1 %168  ;;  %v520_v31 = vld [vmem:[#allocation2 + $0x20] sm:$0xff] }
 0x148   :  { %v1208_v58 = vpop.eup %1207  ;;  %205 = vst.msk [vmem:[#allocation2 + $0x30] sm:$0xff] %vm73_vm1, %v196_v56  ;;  %v183_v59 = vmul.f32 %v1010_v32, %v169_v57 }
 0x149   :  { %284 = vst.msk [vmem:[#allocation2] sm:$0xff] %vm73_vm1, %v1208_v58  ;;  %1081 = vmatmul.mubr.msk.f32.vlgmr.msra.gmra.mrb[0].mxu1 %vm73_vm1, %v1208_v58 }
 0x14a   :  { %v197_v60 = vadd.f32 %v1011_v34, %v183_v59  ;;  %1169 = vmatpush3.bf16.msra.mxu1 %v1438_v5  ;;  %1102 = vmatprep.mubr.msk.f32.mxu1 %vm1347_vm0, %v1348_v1 }
 0x14b   :  { %1170 = vmatprep.subr.bf16.mxu1 %v1346_v0  ;;  %v598_v39 = vld [vmem:[#allocation2 + $0x28] sm:$0xff] }
 0x14c   :  { %206 = vst.msk [vmem:[#allocation2 + $0x38] sm:$0xff] %vm73_vm1, %v197_v60 }
 0x14e   :  { %1172 = vmatpush3.bf16.msra.mxu1 %v1442_v9 }
 0x14f   :  { %1179 = vmatprep.subr.bf16.mxu1 %v1346_v0 }
 0x150   :  { %v832_v62 = vld [vmem:[#allocation2] sm:$0xff] }
 0x151   :  { %v847_v63 = vmul.f32 %v1492_v61, %v832_v62 }
 0x153   :  { %v855_v2 = vsel %vm73_vm1, %v847_v63, 0.0  ;;  %v754_v51 = vld [vmem:[#allocation2 + $0x38] sm:$0xff] }
 0x154   :  { %856 = vadd.xlane.f32.xlu1 %v855_v2  ;;  %v898_v2 = vand.u32 127, %v114_v11 }
 0x1e1   :  { %v857_v59 = vpop.xlane.xlu1 %856 }
 0x21c   :  { %v356_v4 = vpop.f32.mrb[0].mxu1 }
 0x21d   :  { %v360_v6 = vadd.f32 %v356_v4, %v286_v3  ;;  %v1082_v7 = vpop.f32.mrb[1].mxu1  ;;  %v880_v4 = vstv %s1583_s6  ;;  %s1349_s6 = smov [#allocation11]  }
 0x21e   :  { %s996_s23 = sshll.u32 %s1349_s6, 4  ;;  %s997_s23 = int_to_ptr.vmem [resolvable:$true] %s996_s23 }
 0x21f   :  { %1209 = vtanh.f32 %v360_v6  ;;  %s1289_s24 = scalar_lea.vmem %s997_s23, 128  ;;  %p1294_p11 = scmp.lt.s32.totalorder %s997_s23, %s997_s23 }
 0x220   :  { %p1290_p10 = scmp.ne.s32.totalorder %s997_s23, %s1289_s24  ;;  %p1295_p12 = scmp.lt.s32.totalorder %s1289_s24, %s1289_s24 }
 0x222   :  { %p1296_p13 = por %p1295_p12, %p1294_p11 }
 0x224   :  { %p1297_p0 = pnand %p1296_p13, %p1290_p10 }
 0x229   :  { %v1210_v8 = vpop.eup %1209 }
 0x22a   :  { %362 = vst.msk [vmem:[#allocation2 + $0x8] sm:$0xff] %vm73_vm1, %v1210_v8  ;;  %1092 = vmatmul.mubr.msk.f32.vlgmr.msra.gmra.mrb[2].mxu0 %vm73_vm1, %v1210_v8 }
 0x22b   :  { %1175 = vmatpush3.bf16.msra.mxu0 %v1438_v5  ;;  %1113 = vmatprep.mubr.msk.f32.mxu0 %vm1347_vm0, %v1348_v1 }
 0x22c   :  { %1176 = vmatprep.subr.bf16.mxu0 %v1346_v0 }
 0x22f   :  { %1178 = vmatpush3.bf16.msra.mxu0 %v1442_v9 }
 0x230   :  { %1185 = vmatprep.subr.bf16.mxu0 %v1346_v0 }
 0x231   :  { %v833_v10 = vld [vmem:[#allocation2 + $0x8] sm:$0xff] }
 0x232   :  { %v848_v13 = vmul.f32 %v1492_v61, %v833_v10  ;;  %v901_v10 = vsub.s32 %v898_v2, %v1459_v12 }
 0x234   :  { %v858_v14 = vsel %vm73_vm1, %v848_v13, 0.0 }
 0x235   :  { %859 = vadd.xlane.f32.xlu0 %v858_v14 }
 0x2c2   :  { %v860_v63 = vpop.xlane.xlu0 %859 }
 0x2c3   :  { %v882_v6 = vadd.f32 %v880_v4, %v860_v63 }
 0x2fd   :  { %v434_v16 = vpop.f32.mrb[2].mxu0 }
 0x2fe   :  { %v438_v17 = vadd.f32 %v434_v16, %v364_v15  ;;  %v1093_v18 = vpop.f32.mrb[3].mxu0  ;;  %v906_v16 = vrot.slane %v882_v6, %v901_v10 }
 0x300   :  { %1211 = vtanh.f32 %v438_v17 }
 0x30a   :  { %v1212_v19 = vpop.eup %1211 }
 0x30b   :  { %440 = vst.msk [vmem:[#allocation2 + $0x10] sm:$0xff] %vm73_vm1, %v1212_v19  ;;  %1103 = vmatmul.mubr.msk.f32.vlgmr.msra.gmra.mrb[2].mxu1 %vm73_vm1, %v1212_v19 }
 0x30c   :  { %1181 = vmatpush3.bf16.msra.mxu1 %v1438_v5  ;;  %1124 = vmatprep.mubr.msk.f32.mxu1 %vm1347_vm0, %v1348_v1 }
 0x30d   :  { %1182 = vmatprep.subr.bf16.mxu1 %v1346_v0 }
 0x310   :  { %1184 = vmatpush3.bf16.msra.mxu1 %v1442_v9 }
 0x311   :  { %1191 = vmatprep.subr.bf16.mxu1 %v1346_v0 }
 0x312   :  { %v834_v20 = vld [vmem:[#allocation2 + $0x10] sm:$0xff] }
 0x313   :  { %v849_v21 = vmul.f32 %v1492_v61, %v834_v20 }
 0x315   :  { %v861_v22 = vsel %vm73_vm1, %v849_v21, 0.0 }
 0x316   :  { %862 = vadd.xlane.f32.xlu1 %v861_v22 }
 0x3a3   :  { %v863_v60 = vpop.xlane.xlu1 %862 }
 0x3a4   :  { %v883_v7 = vadd.f32 %v880_v4, %v863_v60 }
 0x3a6   :  { %v910_v18 = vrot.slane %v883_v7, %v901_v10 }
 0x3de   :  { %v512_v24 = vpop.f32.mrb[2].mxu1 }
 0x3df   :  { %v516_v25 = vadd.f32 %v512_v24, %v442_v23  ;;  %v1104_v26 = vpop.f32.mrb[3].mxu1 }
 0x3e1   :  { %1213 = vtanh.f32 %v516_v25 }
 0x3eb   :  { %v1214_v27 = vpop.eup %1213 }
 0x3ec   :  { %518 = vst.msk [vmem:[#allocation2 + $0x18] sm:$0xff] %vm73_vm1, %v1214_v27  ;;  %1114 = vmatmul.mubr.msk.f32.vlgmr.msra.gmra.mrb[4].mxu0 %vm73_vm1, %v1214_v27 }
 0x3ed   :  { %1187 = vmatpush3.bf16.msra.mxu0 %v1438_v5  ;;  %1135 = vmatprep.mubr.msk.f32.mxu0 %vm1347_vm0, %v1348_v1 }
 0x3ee   :  { %1188 = vmatprep.subr.bf16.mxu0 %v1346_v0 }
 0x3f1   :  { %1190 = vmatpush3.bf16.msra.mxu0 %v1442_v9 }
 0x3f3   :  { %v835_v28 = vld [vmem:[#allocation2 + $0x18] sm:$0xff] }
 0x3f4   :  { %v850_v29 = vmul.f32 %v1492_v61, %v835_v28 }
 0x3f6   :  { %v864_v30 = vsel %vm73_vm1, %v850_v29, 0.0 }
 0x3f7   :  { %865 = vadd.xlane.f32.xlu1 %v864_v30 }
 0x484   :  { %v866_v62 = vpop.xlane.xlu1 %865 }
 0x485   :  { %v884_v13 = vadd.f32 %v880_v4, %v866_v62 }
 0x487   :  { %v914_v20 = vrot.slane %v884_v13, %v901_v10 }
 0x4bf   :  { %v590_v32 = vpop.f32.mrb[4].mxu0 }
 0x4c0   :  { %v594_v33 = vadd.f32 %v590_v32, %v520_v31  ;;  %v1115_v34 = vpop.f32.mrb[5].mxu0 }
 0x4c2   :  { %1215 = vtanh.f32 %v594_v33 }
 0x4cc   :  { %v1216_v35 = vpop.eup %1215 }
 0x4cd   :  { %596 = vst.msk [vmem:[#allocation2 + $0x20] sm:$0xff] %vm73_vm1, %v1216_v35  ;;  %1125 = vmatmul.mubr.msk.f32.vlgmr.msra.gmra.mrb[4].mxu1 %vm73_vm1, %v1216_v35 }
 0x4ce   :  { %1193 = vmatpush3.bf16.msra.mxu1 %v1438_v5  ;;  %1146 = vmatprep.mubr.msk.f32.mxu1 %vm1347_vm0, %v1348_v1 }
 0x4cf   :  { %1194 = vmatprep.subr.bf16.mxu1 %v1346_v0 }
 0x4d2   :  { %1196 = vmatpush3.bf16.msra.mxu1 %v1442_v9  ;;  %v676_v9 = vld [vmem:[#allocation2 + $0x30] sm:$0xff] }
 0x4d4   :  { %v836_v36 = vld [vmem:[#allocation2 + $0x20] sm:$0xff] }
 0x4d5   :  { %v851_v37 = vmul.f32 %v1492_v61, %v836_v36 }
 0x4d7   :  { %v867_v38 = vsel %vm73_vm1, %v851_v37, 0.0 }
 0x4d8   :  { %868 = vadd.xlane.f32.xlu1 %v867_v38 }
 0x565   :  { %v869_v3 = vpop.xlane.xlu1 %868 }
 0x566   :  { %v885_v15 = vadd.f32 %v880_v4, %v869_v3 }
 0x568   :  { %v918_v21 = vrot.slane %v885_v15, %v901_v10 }
 0x5a0   :  { %v668_v40 = vpop.f32.mrb[4].mxu1 }
 0x5a1   :  { %v672_v41 = vadd.f32 %v668_v40, %v598_v39  ;;  %v1126_v42 = vpop.f32.mrb[5].mxu1 }
 0x5a3   :  { %1217 = vtanh.f32 %v672_v41 }
 0x5ad   :  { %v1218_v43 = vpop.eup %1217 }
 0x5ae   :  { %674 = vst.msk [vmem:[#allocation2 + $0x28] sm:$0xff] %vm73_vm1, %v1218_v43  ;;  %1136 = vmatmul.mubr.msk.f32.vlgmr.msra.gmra.mrb[6].mxu0 %vm73_vm1, %v1218_v43 }
 0x5b5   :  { %v837_v1 = vld [vmem:[#allocation2 + $0x28] sm:$0xff] }
 0x5b6   :  { %v852_v0 = vmul.f32 %v1492_v61, %v837_v1 }
 0x5b8   :  { %v870_v5 = vsel %vm73_vm1, %v852_v0, 0.0 }
 0x5b9   :  { %871 = vadd.xlane.f32.xlu0 %v870_v5 }
 0x646   :  { %v872_v8 = vpop.xlane.xlu0 %871 }
 0x647   :  { %v886_v17 = vadd.f32 %v880_v4, %v872_v8 }
 0x649   :  { %v922_v23 = vrot.slane %v886_v17, %v901_v10 }
 0x681   :  { %v746_v44 = vpop.f32.mrb[6].mxu0 }
 0x682   :  { %v750_v45 = vadd.f32 %v746_v44, %v676_v9  ;;  %v1137_v46 = vpop.f32.mrb[7].mxu0 }
 0x684   :  { %1219 = vtanh.f32 %v750_v45 }
 0x68e   :  { %v1220_v47 = vpop.eup %1219 }
 0x68f   :  { %752 = vst.msk [vmem:[#allocation2 + $0x30] sm:$0xff] %vm73_vm1, %v1220_v47  ;;  %1147 = vmatmul.mubr.msk.f32.vlgmr.msra.gmra.mrb[6].mxu1 %vm73_vm1, %v1220_v47 }
 0x696   :  { %v838_v48 = vld [vmem:[#allocation2 + $0x30] sm:$0xff] }
 0x697   :  { %v853_v49 = vmul.f32 %v1492_v61, %v838_v48 }
 0x699   :  { %v873_v50 = vsel %vm73_vm1, %v853_v49, 0.0 }
 0x69a   :  { %874 = vadd.xlane.f32.xlu1 %v873_v50 }
 0x727   :  { %v875_v14 = vpop.xlane.xlu1 %874 }
 0x728   :  { %v887_v19 = vadd.f32 %v880_v4, %v875_v14 }
 0x72a   :  { %v926_v25 = vrot.slane %v887_v19, %v901_v10 }
 0x762   :  { %v824_v52 = vpop.f32.mrb[6].mxu1 }
 0x763   :  { %v828_v53 = vadd.f32 %v824_v52, %v754_v51  ;;  %v1148_v54 = vpop.f32.mrb[7].mxu1 }
 0x765   :  { %1221 = vtanh.f32 %v828_v53 }
 0x76f   :  { %v1222_v55 = vpop.eup %1221 }
 0x770   :  { %830 = vst.msk [vmem:[#allocation2 + $0x38] sm:$0xff] %vm73_vm1, %v1222_v55  ;;  %831 = vst.msk [vmem:[#allocation11] sm:$0xff] %vm73_vm1, %v1222_v55 }
 0x777   :  { %v839_v56 = vld [vmem:[#allocation2 + $0x38] sm:$0xff] }
 0x778   :  { %v854_v57 = vmul.f32 %v1492_v61, %v839_v56  ;;  %v881_v61 = vadd.f32 %v880_v4, %v857_v59 }
 0x77a   :  { %v876_v58 = vsel %vm73_vm1, %v854_v57, 0.0  ;;  %v902_v11 = vrot.slane %v881_v61, %v901_v10 }
 0x77b   :  { %877 = vadd.xlane.f32.xlu0 %v876_v58 }
 0x77c   :  { %v932_v22 = vsel %vm931_vm2, %v906_v16, %v902_v11 }
 0x77d   :  { %v934_v24 = vsel %vm933_vm3, %v910_v18, %v932_v22 }
 0x77e   :  { %v936_v26 = vsel %vm935_vm4, %v914_v20, %v934_v24 }
 0x77f   :  { %v938_v28 = vsel %vm937_vm5, %v918_v21, %v936_v26 }
 0x780   :  { %v940_v30 = vsel %vm939_vm6, %v922_v23, %v938_v28 }
 0x781   :  { %v942_v31 = vsel %vm941_vm7, %v926_v25, %v940_v30 }
 0x808   :  { %v878_v12 = vpop.xlane.xlu0 %877 }
 0x809   :  { %v888_v27 = vadd.f32 %v880_v4, %v878_v12 }
 0x80b   :  { %v930_v29 = vrot.slane %v888_v27, %v901_v10 }
 0x80d   :  { %v944_v32 = vsel %vm943_vm8, %v930_v29, %v942_v31 }
 0x80e   :  { %946 = vxpose.xlu1.b32.start.end [1/1] (short) (narrow) %v944_v32, 8 }
 0x80f   :  { %1300 = shalt.err (!%p1297_p0)
}
 0x810   :  { %s1301_s1 = scalar_lea.hbm %s1585_s8, 128 }
 0x811   :  { %p1302_p1 = scmp.ne.s32.totalorder %s1585_s8, %s1301_s1  ;;  %p1305_p2 = scmp.lt.u32.totalorder %s1301_s1, %s1585_s8 }
 0x813   :  { %p1307_p3 = pnand %p1305_p2, %p1302_p1 }
 0x815   :  { %1310 = shalt.err (!%p1307_p3)
}
 0x816   :  { %999 = dma.vmem_to_hbm [thread:$0]  %s997_s23, 128, %s1585_s8, [#allocation12]   ;;  %vm978_vm9 = vcmask 64512  }
 0x817   :  { %s1350_s12 = smov [#allocation10]  }
 0x818   :  { %s986_s13 = sshll.u32 %s1350_s12, 4  ;;  %s987_s13 = int_to_ptr.vmem [resolvable:$true] %s986_s13 }
 0x819   :  { %s1311_s14 = scalar_lea.vmem %s987_s13, 128  ;;  %p1316_p5 = scmp.lt.s32.totalorder %s987_s13, %s987_s13 }
 0x81a   :  { %p1312_p4 = scmp.ne.s32.totalorder %s987_s13, %s1311_s14  ;;  %p1317_p6 = scmp.lt.s32.totalorder %s1311_s14, %s1311_s14 }
 0x81c   :  { %p1318_p7 = por %p1317_p6, %p1316_p5 }
 0x81e   :  { %p1319_p8 = pnand %p1318_p7, %p1312_p4 }
 0x88e   :  { %v962_v33 = vpop.trf.xlu1 }
 0x88f   :  { %979 = vst.msk [vmem:[#allocation10] sm:$0xff] %vm978_vm9, %v962_v33 }
 0x890   :  { %1322 = shalt.err (!%p1319_p8)
}
 0x891   :  { %s1323_s0 = scalar_lea.hbm %s1584_s7, 128 }
 0x892   :  { %p1324_p9 = scmp.ne.s32.totalorder %s1584_s7, %s1323_s0  ;;  %p1327_p10 = scmp.lt.u32.totalorder %s1323_s0, %s1584_s7 }
 0x894   :  { %p1329_p11 = pnand %p1327_p10, %p1324_p9 }
 0x896   :  { %1332 = shalt.err (!%p1329_p11)
}
 0x897   :  { %989 = dma.vmem_to_hbm [thread:$0]  %s987_s13, 128, %s1584_s7, [#allocation6]  }
 0x898   :  { %1337 = dma.done.wait [#allocation6], 128  }
 0x899   :  { %1338 = vsyncadd [#allocation6], 4294967168 }
 0x89a   :  { %1339 = dma.done.wait [#allocation12], 128  }
 0x89b   :  { %1340 = vsyncadd [#allocation12], 4294967168 }
 0x89c   :  { %1006 = vsyncpa [#allocation5], 1 }
 0x89d   :  { %1007 = vsyncpa [#allocation8], 1 }
 0x89e   :  { %1008 = vsyncpa [#allocation6], 1 }
 0x89f   :  { %1009 = vsyncpa [#allocation12], 1 }

</bundles_post_ra>
